<compile_context>
chip_gen: v6e
topology: v6e:2x2x1
jax: 0.10.0
libtpu: 0.0.40
codegen_flags: <defaults>
</compile_context>

<pallas_src>
import jax
import jax.numpy as jnp
from jax.experimental import pallas as pl
from jax.experimental.pallas import tpu as pltpu

LANES = 128
ACC_R = 512          # fixed small accumulator: (512, 128) f32 = 256 KiB VMEM
TINY_ROWS = 2048     # <= 1 MiB f32 per tensor -> single-block fast path


def _round_up(v, m):
    return ((v + m - 1) // m) * m


def _device_params():
    """(ncores, max_tile_r) tuned per TPU generation; conservative defaults."""
    try:
        kind = jax.devices()[0].device_kind.lower()
    except Exception:
        kind = ""
    is_v7 = ("v7" in kind) or ("tpu7" in kind)
    is_v6 = "v6" in kind
    # 2-way leading 'parallel' split only on multi-TensorCore chips (v7x).
    # TODO(synk): if xprof shows a single busy TC on v7x, switch the leading
    # axis to pltpu.CORE_PARALLEL (or pl.core_map over a tensorcore mesh).
    ncores = 2 if is_v7 else 1
    # ~4 MiB input blocks on v6e/v7x (32 MiB default scoped VMEM),
    # ~2 MiB elsewhere (v5e and older: 16 MiB default scoped VMEM).
    max_tile_r = 8192 if (is_v6 or is_v7) else 4096
    return ncores, max_tile_r


def _loss_kernel_small(x_ref, y_ref, out_ref):
    d = y_ref[...].astype(jnp.float32) - x_ref[...].astype(jnp.float32)
    out_ref[0, 0] = jnp.sum(jnp.sqrt(d * d + 1e-6))


def loss_pallas(x, y):
    """mean(sqrt((y - x)^2 + 1e-6)) computed with Pallas TPU kernels."""
    assert x.shape == y.shape, (x.shape, y.shape)
    n = x.size

    xf = x.reshape(-1)
    yf = y.reshape(-1)

    # Only a sub-128 flat tail is ever padded (<= 127 zeros, rare); each zero
    # pad element contributes exactly sqrt(1e-6), corrected analytically below.
    pad = (-n) % LANES
    if pad:
        # TODO(synk): lane-mask the last row in-kernel to avoid this copy.
        xf = jnp.pad(xf, (0, pad))
        yf = jnp.pad(yf, (0, pad))
    rows = (n + pad) // LANES
    x2 = xf.reshape(rows, LANES)     # zero-copy when pad == 0
    y2 = yf.reshape(rows, LANES)

    if rows <= TINY_ROWS:
        # Tiny-input fast path: one block, one grid step, no accumulator.
        total = pl.pallas_call(
            _loss_kernel_small,
            out_shape=jax.ShapeDtypeStruct((1, 1), jnp.float32),
            grid=(1,),
            in_specs=[pl.BlockSpec((rows, LANES), lambda i: (0, 0)),
                      pl.BlockSpec((rows, LANES), lambda i: (0, 0))],
            out_specs=pl.BlockSpec((1, 1), lambda i: (0, 0),
                                   memory_space=pltpu.SMEM),
        )(x2, y2)[0, 0]
    else:
        ncores, max_tile_r = _device_params()
        tile_r = min(max_tile_r, _round_up(pl.cdiv(rows, ncores), ACC_R))
        tile_r = min(tile_r, (rows // ACC_R) * ACC_R)   # never exceeds rows
        total_blocks = pl.cdiv(rows, tile_r)
        blocks_per_core = pl.cdiv(total_blocks, ncores)

        def index_map(c, i):
            # Clamp so no DMA starts past the array; fully out-of-range
            # logical blocks re-read the last block and are masked to zero.
            return (jnp.minimum(c * blocks_per_core + i, total_blocks - 1), 0)

        def kernel(x_ref, y_ref, out_ref, acc_ref):
            i = pl.program_id(1)

            @pl.when(i == 0)
            def _():
                acc_ref[...] = jnp.zeros_like(acc_ref)

            # Steady state: VPU (sub/mul/add/select) + EUP (sqrt) only.
            d = y_ref[...].astype(jnp.float32) - x_ref[...].astype(jnp.float32)
            v = jnp.sqrt(d * d + 1e-6)

            # Mask rows past the end (partial last block / over-covered blocks).
            row0 = (pl.program_id(0) * blocks_per_core + i) * tile_r
            row_idx = row0 + jax.lax.broadcasted_iota(jnp.int32, (tile_r, 1), 0)
            v = jnp.where(row_idx < rows, v, 0.0)

            # Fold the tile into the small fixed accumulator (row-block adds).
            acc_ref[...] += v.reshape(tile_r // ACC_R, ACC_R, LANES).sum(axis=0)

            # Finalize: one cross-lane reduction per core -> scalar partial.
            @pl.when(i == pl.num_programs(1) - 1)
            def _():
                out_ref[0, 0] = jnp.sum(acc_ref[...])

        itemsize = jnp.dtype(x.dtype).itemsize
        partials = pl.pallas_call(
            kernel,
            out_shape=jax.ShapeDtypeStruct((ncores, 1), jnp.float32),
            grid=(ncores, blocks_per_core),
            in_specs=[pl.BlockSpec((tile_r, LANES), index_map),
                      pl.BlockSpec((tile_r, LANES), index_map)],
            out_specs=pl.BlockSpec((1, 1), lambda c, i: (c, 0),
                                   memory_space=pltpu.SMEM),
            scratch_shapes=[pltpu.VMEM((ACC_R, LANES), jnp.float32)],
            compiler_params=pltpu.CompilerParams(
                dimension_semantics=("parallel", "arbitrary")),
            cost_estimate=pl.CostEstimate(
                flops=4 * n, transcendentals=n,
                bytes_accessed=2 * n * itemsize + 4 * ncores),
        )(x2, y2)
        total = jnp.sum(partials)

    # Each zero-padded flat element contributed exactly sqrt(1e-6).
    total = total - jnp.float32(pad) * jnp.sqrt(jnp.float32(1e-6))
    return total / jnp.float32(n)


def loss_ref(x, y):
    # pure-JAX reference for verification
    xf = x.astype(jnp.float32)
    yf = y.astype(jnp.float32)
    return jnp.mean(jnp.sqrt((yf - xf) ** 2 + 1e-6))


if __name__ == "__main__":
    key = jax.random.PRNGKey(0)
    kx, ky = jax.random.split(key)
    # NCHW inputs, same shape for x and y (prediction / target)
    x = jax.random.normal(kx, (2, 4, 16, 16), dtype=jnp.float32)
    y = jax.random.normal(ky, (2, 4, 16, 16), dtype=jnp.float32)

    out = loss_pallas(x, y)
    jax.block_until_ready(out)

    ref = loss_ref(x, y)
    assert jnp.allclose(out, ref, rtol=1e-5, atol=1e-6), (out, ref)
    print("KERNEL_OK")
</pallas_src>

<mosaic_0001>
module attributes {stable_mosaic.version = 11 : i64} {
  func.func @_loss_kernel_small(%arg0: i32, %arg1: memref<16x128xf32, #tpu.memory_space<vmem>>, %arg2: memref<16x128xf32, #tpu.memory_space<vmem>>, %arg3: memref<1x1xf32, #tpu.memory_space<smem>>) attributes {dimension_semantics = [#tpu.dimension_semantics<arbitrary>], iteration_bounds = array<i64: 1>, scalar_prefetch = 0 : i64, scratch_operands = 0 : i64, tpu.core_type = #tpu.core_type<tc>, window_params = [{pipeline_mode = #tpu.pipeline_mode<synchronous>, transform_indices = @transform_0, window_bounds = array<i64: 16, 128>}, {pipeline_mode = #tpu.pipeline_mode<synchronous>, transform_indices = @transform_1, window_bounds = array<i64: 16, 128>}, {transform_indices = @transform_2, window_bounds = array<i64: 1, 1>}]} {
    %c0 = arith.constant 0 : index
    %c0_0 = arith.constant 0 : index
    %0 = vector.load %arg2[%c0, %c0_0] : memref<16x128xf32, #tpu.memory_space<vmem>>, vector<16x128xf32>
    %c0_1 = arith.constant 0 : index
    %c0_2 = arith.constant 0 : index
    %1 = vector.load %arg1[%c0_1, %c0_2] : memref<16x128xf32, #tpu.memory_space<vmem>>, vector<16x128xf32>
    %2 = arith.subf %0, %1 : vector<16x128xf32>
    %3 = arith.mulf %2, %2 : vector<16x128xf32>
    %cst = arith.constant 9.99999997E-7 : f32
    %4 = vector.broadcast %cst : f32 to vector<16x128xf32>
    %5 = arith.addf %3, %4 : vector<16x128xf32>
    %6 = math.sqrt %5 : vector<16x128xf32>
    %7 = vector.shape_cast %6 : vector<16x128xf32> to vector<1x16x128xf32>
    %cst_3 = arith.constant dense<0.000000e+00> : vector<1xf32>
    %8 = vector.multi_reduction <add>, %7, %cst_3 [1, 2] : vector<1x16x128xf32> to vector<1xf32>
    %9 = vector.shape_cast %8 : vector<1xf32> to vector<1x1x1xf32>
    %10 = vector.extract %9[0, 0, 0] : f32 from vector<1x1x1xf32>
    %c0_4 = arith.constant 0 : index
    %c0_5 = arith.constant 0 : index
    %11 = memref.load %arg3[%c0_4, %c0_5] : memref<1x1xf32, #tpu.memory_space<smem>>
    memref.store %10, %arg3[%c0_4, %c0_5] : memref<1x1xf32, #tpu.memory_space<smem>>
    return
  }
  func.func @transform_0(%arg0: i32) -> (i32, i32) {
    %c0_i32 = arith.constant 0 : i32
    %c0_i32_0 = arith.constant 0 : i32
    %c0_i32_1 = arith.constant 0 : i32
    return %c0_i32, %c0_i32_0 : i32, i32
  }
  func.func @transform_1(%arg0: i32) -> (i32, i32) {
    %c0_i32 = arith.constant 0 : i32
    %c0_i32_0 = arith.constant 0 : i32
    %c0_i32_1 = arith.constant 0 : i32
    return %c0_i32, %c0_i32_0 : i32, i32
  }
  func.func @transform_2(%arg0: i32) -> (i32, i32) {
    %c0_i32 = arith.constant 0 : i32
    %c0_i32_0 = arith.constant 0 : i32
    %c0_i32_1 = arith.constant 0 : i32
    return %c0_i32, %c0_i32_0 : i32, i32
  }
}

</mosaic_0001>

<bundles_post_ra>
// kernel: tpu_custom_call.1
= control target key start
LH: loop header
LB: loop body
LE: loop exit
PB: predicated region body
PF: predicated region fallthrough
CT: control target
= control target key end

     0   :  { %7 = vsyncpa [#allocation3], 0  ;;  %s185_s0 = inlined_call_operand.hbm [shape: f32[16,128], index: 0, kind: input, shape index: {}]   ;;  %s186_s1 = inlined_call_operand.hbm [shape: f32[16,128], index: 1, kind: input, shape index: {}]   ;;  %s187_s2 = inlined_call_operand.hbm [shape: f32[1,1], index: 2, kind: output, shape index: {}]  }
   0x1   :  { %8 = vsyncpa [#allocation6], 0 }
   0x2   :  { %9 = vsyncpa [#allocation4], 0  ;;  %s156_s9 = smov [#allocation2]  }
   0x3   :  { %s15_s10 = sshll.u32 %s156_s9, 4  ;;  %s16_s10 = int_to_ptr.vmem [resolvable:$true] %s15_s10 }
   0x4   :  { %s110_s11 = scalar_lea.vmem %s16_s10, 256  ;;  %p115_p1 = scmp.lt.s32.totalorder %s16_s10, %s16_s10 }
   0x5   :  { %p111_p0 = scmp.ne.s32.totalorder %s16_s10, %s110_s11  ;;  %p116_p2 = scmp.lt.s32.totalorder %s110_s11, %s110_s11 }
   0x7   :  { %p117_p3 = por %p116_p2, %p115_p1 }
   0x9   :  { %p118_p4 = pnand %p117_p3, %p111_p0 }
   0xb   :  { %121 = shalt.err (!%p118_p4)
}
   0xc   :  { %s157_s12 = smov 128   ;;  %s158_s13 = smov 8  }
   0xd   :  { %21 = dma.hbm_to_vmem [thread:$0]  %s185_s0, 256, %s16_s10, [#allocation3], %s157_s12, %s157_s12, %s158_s13  }
   0xe   :  { %s159_s16 = smov [#allocation5]  }
   0xf   :  { %s27_s17 = sshll.u32 %s159_s16, 4  ;;  %s28_s17 = int_to_ptr.vmem [resolvable:$true] %s27_s17 }
  0x10   :  { %s130_s18 = scalar_lea.vmem %s28_s17, 256  ;;  %p135_p6 = scmp.lt.s32.totalorder %s28_s17, %s28_s17 }
  0x11   :  { %p131_p5 = scmp.ne.s32.totalorder %s28_s17, %s130_s18  ;;  %p136_p7 = scmp.lt.s32.totalorder %s130_s18, %s130_s18 }
  0x13   :  { %p137_p8 = por %p136_p7, %p135_p6 }
  0x15   :  { %p138_p9 = pnand %p137_p8, %p131_p5 }
  0x17   :  { %141 = shalt.err (!%p138_p9)
}
  0x18   :  { %33 = dma.hbm_to_vmem [thread:$0]  %s186_s1, 256, %s28_s17, [#allocation6], %s157_s12, %s157_s12, %s158_s13  }
  0x19   :  { %150 = dma.done.wait [#allocation3], 256  }
  0x1a   :  { %151 = vsyncadd [#allocation3], 4294967040 }
  0x1b   :  { %152 = dma.done.wait [#allocation6], 256  }
  0x1c   :  { %153 = vsyncadd [#allocation6], 4294967040  ;;  %v40_v0 = vld [vmem:[#allocation5] sm:$0xff]  ;;  %v41_v1 = vld [vmem:[#allocation5 + $0x8] sm:$0xff]  ;;  %s160_s1 = smov [#allocation7]  }
  0x1d   :  { %v42_v2 = vld [vmem:[#allocation2] sm:$0xff]  ;;  %v43_v3 = vld [vmem:[#allocation2 + $0x8] sm:$0xff] }
  0x1e   :  { %v44_v4 = vsub.f32 %v40_v0, %v42_v2  ;;  %v45_v5 = vsub.f32 %v41_v1, %v43_v3 }
  0x20   :  { %v46_v6 = vmul.f32 %v44_v4, %v44_v4  ;;  %v47_v7 = vmul.f32 %v45_v5, %v45_v5 }
  0x22   :  { %v48_v8 = vadd.f32 1e-06, %v46_v6  ;;  %v49_v9 = vadd.f32 1e-06, %v47_v7 }
  0x24   :  { %98 = vrsqrt.f32 %v48_v8  ;;  %vm52_vm0 = vcmp.eq.f32.partialorder %v48_v8, inf  ;;  %v55_v11 = vand.u32 2147483648, %v48_v8  ;;  %vm54_vm1 = vcmp.eq.f32.partialorder %v48_v8, 0.0 }
  0x25   :  { %100 = vrsqrt.f32 %v49_v9  ;;  %vm59_vm2 = vcmp.eq.f32.partialorder %v49_v9, inf  ;;  %v62_v14 = vand.u32 2147483648, %v49_v9  ;;  %vm61_vm3 = vcmp.eq.f32.partialorder %v49_v9, 0.0 }
  0x31   :  { %v99_v10 = vpop.eup %98 }
  0x32   :  { %v101_v12 = vpop.eup %100  ;;  %v51_v13 = vmul.f32 %v99_v10, %v48_v8 }
  0x33   :  { %v58_v15 = vmul.f32 %v101_v12, %v49_v9 }
  0x34   :  { %v53_v16 = vsel %vm52_vm0, %v48_v8, %v51_v13 }
  0x35   :  { %v56_v17 = vsel %vm54_vm1, %v55_v11, %v53_v16  ;;  %v60_v18 = vsel %vm59_vm2, %v49_v9, %v58_v15 }
  0x36   :  { %v63_v19 = vsel %vm61_vm3, %v62_v14, %v60_v18 }
  0x37   :  { %v64_v20 = vadd.f32 %v63_v19, %v56_v17 }
  0x39   :  { %65 = vadd.xlane.f32.xlu0 %v64_v20 }
  0xc2   :  { %v66_v21 = vpop.xlane.xlu0 %65 }
  0xc3   :  { %v67_v22 = vrot.slane %v66_v21, 4 }
  0xc5   :  { %v68_v23 = vadd.f32 %v67_v22, %v66_v21 }
  0xc7   :  { %v69_v24 = vrot.slane %v68_v23, 2 }
  0xc9   :  { %v70_v25 = vadd.f32 %v69_v24, %v68_v23 }
  0xcb   :  { %v71_v26 = vrot.slane %v70_v25, 1 }
  0xcd   :  { %v72_v27 = vadd.f32 %v71_v26, %v70_v25 }
  0xcf   :  { %91 = vpush %v72_v27 }
 0x100   :  { %s92_s0 = spop %91 }
 0x101   :  { %75 = sst [smem:[#allocation7]] %s92_s0 }
 0x102   :  { %83 = dma.smem_to_hbm %s160_s1, 16, %s187_s2, [#allocation4]  }
 0x103   :  { %154 = dma.done.wait [#allocation4], 16  }
 0x104   :  { %155 = vsyncadd [#allocation4], 4294967280 }
 0x105   :  { %87 = sfence }
 0x106   :  { %88 = vsyncpa [#allocation3], 1 }
 0x107   :  { %89 = vsyncpa [#allocation6], 1 }
 0x108   :  { %90 = vsyncpa [#allocation4], 1 }

</bundles_post_ra>
